<compile_context>
chip_gen: v5e
topology: v5e:2x2
jax: 0.10.0
libtpu: 0.0.40
codegen_flags: <defaults>
</compile_context>

<pallas_src>
import functools
import math

import jax
import jax.numpy as jnp
from jax.experimental import pallas as pl
from jax.experimental.pallas import tpu as pltpu

EPS = 1e-8


# ----------------------------- Pallas kernels -----------------------------

def _gen_residual_kernel(y_ref, mel_ref, w1y_ref, w1m_ref, b1_ref, w2_ref,
                         b2_ref, z_ref):
    """Fused generator stand-in + residual on flattened frames.

    y_ref   : (TM, hop)     f32  non-overlapping waveform frames
    mel_ref : (TM, n_mels)  f32  matching mel frames
    w1y/w1m : bf16 first-layer weights (w1 split along the input axis)
    b1      : (1, H)  f32 ; w2 : (H, hop) bf16 ; b2 : (1, hop) f32
    z_ref   : (TM, hop)     f32  y - est
    """
    y = y_ref[...]
    w1y = w1y_ref[...]
    w1m = w1m_ref[...]
    h = jnp.dot(y.astype(w1y.dtype), w1y, preferred_element_type=jnp.float32)
    h = h + jnp.dot(mel_ref[...].astype(w1m.dtype), w1m,
                    preferred_element_type=jnp.float32)
    h = jnp.tanh(h + b1_ref[...])
    w2 = w2_ref[...]
    est = jnp.dot(h.astype(w2.dtype), w2,
                  preferred_element_type=jnp.float32) + b2_ref[...]
    z_ref[...] = y - est


def _stft_gain_kernel(num_frame, n_chunks, hop, n_freq,
                      chunks_ref, z_ref, dftw_ref, powc_ref, o_ref):
    """Windowed real-DFT power reduction + gain scaling, fully in VMEM.

    chunks_ref : (B*n_chunks, hop)  reflect-padded signal cut into hop chunks
    z_ref      : (B, L)             unscaled residual waveform
    dftw_ref   : (n_fft, Npad)      window-folded [cos | -sin | 0-pad] DFT
    powc_ref   : (B,) in SMEM       mean(pstft^2) per batch
    o_ref      : (B, L)             z * sqrt(pow_c / (pow_z + EPS))
    """
    B = z_ref.shape[0]
    n_pad = dftw_ref.shape[1]
    r = dftw_ref.shape[0] // hop          # n_fft // hop overlapping chunks
    inv_count = 1.0 / float(n_freq * num_frame)

    for b in range(B):                    # static unroll, no grid-step overhead
        base = b * n_chunks
        spec = jnp.zeros((num_frame, n_pad), jnp.float32)
        for k in range(r):
            ck = chunks_ref[base + k: base + k + num_frame, :]   # (F, hop)
            dk = dftw_ref[k * hop:(k + 1) * hop, :]              # (hop, Npad)
            spec = spec + jnp.dot(ck, dk, preferred_element_type=jnp.float32)
        # re^2 + im^2 summed over freq & frame; zero-padded lanes add nothing.
        pow_z = jnp.sum(spec * spec) * inv_count
        scale = jnp.sqrt(powc_ref[b] / (pow_z + EPS))
        o_ref[b:b + 1, :] = z_ref[b:b + 1, :] * scale


# ----------------------------- wrappers ------------------------------------

def _round_up(x, m):
    return ((x + m - 1) // m) * m


def make_windowed_dft(n_fft, win_size):
    """Hann(win_size) centered in n_fft, folded into a fused [cos | -sin]
    real-DFT matrix whose lane dim is zero-padded to a multiple of 128."""
    n = jnp.arange(win_size, dtype=jnp.float32)
    hann = 0.5 - 0.5 * jnp.cos(2.0 * jnp.pi * n / win_size)       # periodic Hann
    lpad = (n_fft - win_size) // 2
    window = jnp.pad(hann, (lpad, n_fft - win_size - lpad))       # (n_fft,)
    n_freq = n_fft // 2 + 1
    t = jnp.arange(n_fft, dtype=jnp.float32)[:, None]
    k = jnp.arange(n_freq, dtype=jnp.float32)[None, :]
    ang = 2.0 * jnp.pi * t * k / float(n_fft)
    mat = jnp.concatenate([jnp.cos(ang), -jnp.sin(ang)], axis=1)  # (n_fft, 2*n_freq)
    n_pad = _round_up(2 * n_freq, 128)
    mat = jnp.pad(mat, ((0, 0), (0, n_pad - 2 * n_freq)))
    return (window[:, None] * mat).astype(jnp.float32)            # (n_fft, n_pad)


def generator_residual(y_flat, mel_flat, params_t):
    """z = y - MLP([y_frames ; mel_frames]) on the flattened frame matrix."""
    rows, hop = y_flat.shape
    n_mels = mel_flat.shape[1]
    w1y, w1m, b1, w2, b2 = params_t
    H = w1y.shape[1]

    tm = rows if rows <= 512 else 512          # frame-tile for long audio / 2 TCs
    assert rows % tm == 0

    return pl.pallas_call(
        _gen_residual_kernel,
        out_shape=jax.ShapeDtypeStruct((rows, hop), jnp.float32),
        grid=(rows // tm,),
        in_specs=[
            pl.BlockSpec((tm, hop), lambda i: (i, 0)),
            pl.BlockSpec((tm, n_mels), lambda i: (i, 0)),
            pl.BlockSpec((hop, H), lambda i: (0, 0)),
            pl.BlockSpec((n_mels, H), lambda i: (0, 0)),
            pl.BlockSpec((1, H), lambda i: (0, 0)),
            pl.BlockSpec((H, hop), lambda i: (0, 0)),
            pl.BlockSpec((1, hop), lambda i: (0, 0)),
        ],
        out_specs=pl.BlockSpec((tm, hop), lambda i: (i, 0)),
        compiler_params=pltpu.CompilerParams(dimension_semantics=("parallel",)),
    )(y_flat, mel_flat, w1y, w1m, b1, w2, b2)


def stft_gain(z, chunks, dftw, pow_c, *, num_frame, n_chunks, hop, n_freq):
    """adjust_gain: STFT power mean + per-batch rescale, one pallas_call."""
    B, L = z.shape
    n_fft, n_pad = dftw.shape
    kernel = functools.partial(_stft_gain_kernel, num_frame, n_chunks, hop, n_freq)
    return pl.pallas_call(
        kernel,
        out_shape=jax.ShapeDtypeStruct((B, L), jnp.float32),
        grid=(1,),
        in_specs=[
            pl.BlockSpec((B * n_chunks, hop), lambda i: (0, 0)),
            pl.BlockSpec((B, L), lambda i: (0, 0)),
            pl.BlockSpec((n_fft, n_pad), lambda i: (0, 0)),
            pl.BlockSpec(memory_space=pltpu.MemorySpace.SMEM),
        ],
        out_specs=pl.BlockSpec((B, L), lambda i: (0, 0)),
        compiler_params=pltpu.CompilerParams(dimension_semantics=("arbitrary",)),
    )(chunks, z, dftw, pow_c)


def wavefit_forward(initial_noise, log_mel_spec, pstft_spec, gen_params,
                    args_mel, num_iteration, return_only_last=False):
    """Mirrors WaveFit.forward."""
    hop = args_mel["hop_size"]
    n_fft = args_mel["n_fft"]
    win_size = args_mel["win_size"]

    assert initial_noise.ndim == log_mel_spec.ndim == 3
    assert initial_noise.shape[-1] == log_mel_spec.shape[-1] * hop
    # TODO(synk): in-kernel framing assumes hop | n_fft; a non-dividing hop
    # (e.g. 300 vs n_fft=2048) needs per-frame DMA framing instead.
    assert n_fft % hop == 0

    B, _, L = initial_noise.shape
    n_mels, F = log_mel_spec.shape[1], log_mel_spec.shape[2]
    r = n_fft // hop
    pad = n_fft // 2
    n_chunks = (L + 2 * pad) // hop               # = F + r
    num_frame = pstft_spec.shape[-1]
    n_freq = n_fft // 2 + 1
    assert num_frame + r - 1 <= n_chunks          # [..., :num_frame] in range

    dftw = make_windowed_dft(n_fft, win_size)
    pow_c = jnp.mean(pstft_spec.astype(jnp.float32) ** 2, axis=(1, 2))   # (B,)

    # Loop-invariant: mel frames flattened once.
    mel_flat = jnp.transpose(log_mel_spec, (0, 2, 1)).reshape(B * F, n_mels)
    mel_flat = mel_flat.astype(jnp.float32)

    preds = []
    y = initial_noise.reshape(B, L).astype(jnp.float32)
    for t in range(num_iteration):
        # Generator + residual (fused kernel); reshape is a free bitcast.
        z = generator_residual(y.reshape(B * F, hop), mel_flat,
                               gen_params[t]).reshape(B, L)
        # Centered reflect pad (tiny), chunked view for in-kernel framing.
        zp = jnp.pad(z, ((0, 0), (pad, pad)), mode="reflect")
        chunks = zp.reshape(B * n_chunks, hop)
        # STFT power mean + gain scale (fused kernel) -> next y_t.
        y = stft_gain(z, chunks, dftw, pow_c, num_frame=num_frame,
                      n_chunks=n_chunks, hop=hop, n_freq=n_freq)
        if (not return_only_last) or t == num_iteration - 1:
            preds.append(y.reshape(B, 1, L))
    return preds


# ----------------------------- main ----------------------------------------

if __name__ == "__main__":
    args_mel = {"sr": 2400, "n_fft": 64, "win_size": 48, "hop_size": 16,
                "n_mels": 8, "fmin": 20.0, "fmax": 1200.0}
    B, T = 2, 2
    F = 8                                   # mel frames
    hop = args_mel["hop_size"]
    n_mels = args_mel["n_mels"]
    L = F * hop                             # 128 samples (lane-dense)
    n_freq = args_mel["n_fft"] // 2 + 1     # 33
    hidden = 128                            # lane-dense hidden dim

    key = jax.random.PRNGKey(0)
    k_noise, k_mel, k_spec, k_par = jax.random.split(key, 4)

    initial_noise = jax.random.normal(k_noise, (B, 1, L), dtype=jnp.float32)
    log_mel_spec = jax.random.normal(k_mel, (B, n_mels, F), dtype=jnp.float32)
    pstft_spec = jnp.abs(jax.random.normal(k_spec, (B, n_freq, F),
                                           dtype=jnp.float32)) + 0.1

    # Deterministic generator stand-in parameters (one set per iteration),
    # bf16 weights / f32 biases.
    gen_params = []
    pkeys = jax.random.split(k_par, T * 3)
    din = hop + n_mels
    for t in range(T):
        w1y = (jax.random.normal(pkeys[3 * t], (hop, hidden), jnp.float32)
               * (0.3 / math.sqrt(din))).astype(jnp.bfloat16)
        w1m = (jax.random.normal(pkeys[3 * t + 1], (n_mels, hidden), jnp.float32)
               * (0.3 / math.sqrt(din))).astype(jnp.bfloat16)
        b1 = jnp.zeros((1, hidden), jnp.float32)
        w2 = (jax.random.normal(pkeys[3 * t + 2], (hidden, hop), jnp.float32)
              * (0.3 / math.sqrt(hidden))).astype(jnp.bfloat16)
        b2 = jnp.zeros((1, hop), jnp.float32)
        gen_params.append((w1y, w1m, b1, w2, b2))

    run = jax.jit(lambda noise, mel, spec, params: wavefit_forward(
        noise, mel, spec, params, args_mel, T, return_only_last=False))
    preds = run(initial_noise, log_mel_spec, pstft_spec, gen_params)
    preds = [jax.block_until_ready(p) for p in preds]

    assert len(preds) == T
    for p in preds:
        assert p.shape == (B, 1, L)
        assert bool(jnp.all(jnp.isfinite(p)))
    print("KERNEL_OK")
</pallas_src>

<mosaic_0001>
module attributes {stable_mosaic.version = 11 : i64} {
  func.func @_gen_residual_kernel(%arg0: i32, %arg1: memref<16x16xf32, #tpu.memory_space<vmem>>, %arg2: memref<16x8xf32, #tpu.memory_space<vmem>>, %arg3: memref<16x128xbf16, #tpu.memory_space<vmem>>, %arg4: memref<8x128xbf16, #tpu.memory_space<vmem>>, %arg5: memref<1x128xf32, #tpu.memory_space<vmem>>, %arg6: memref<128x16xbf16, #tpu.memory_space<vmem>>, %arg7: memref<1x16xf32, #tpu.memory_space<vmem>>, %arg8: memref<16x16xf32, #tpu.memory_space<vmem>>) attributes {dimension_semantics = [#tpu.dimension_semantics<parallel>], iteration_bounds = array<i64: 1>, scalar_prefetch = 0 : i64, scratch_operands = 0 : i64, tpu.core_type = #tpu.core_type<tc>, window_params = [{transform_indices = @transform_0, window_bounds = array<i64: 16, 16>}, {transform_indices = @transform_1, window_bounds = array<i64: 16, 8>}, {pipeline_mode = #tpu.pipeline_mode<synchronous>, transform_indices = @transform_2, window_bounds = array<i64: 16, 128>}, {pipeline_mode = #tpu.pipeline_mode<synchronous>, transform_indices = @transform_3, window_bounds = array<i64: 8, 128>}, {pipeline_mode = #tpu.pipeline_mode<synchronous>, transform_indices = @transform_4, window_bounds = array<i64: 1, 128>}, {pipeline_mode = #tpu.pipeline_mode<synchronous>, transform_indices = @transform_5, window_bounds = array<i64: 128, 16>}, {pipeline_mode = #tpu.pipeline_mode<synchronous>, transform_indices = @transform_6, window_bounds = array<i64: 1, 16>}, {transform_indices = @transform_7, window_bounds = array<i64: 16, 16>}]} {
    %c0 = arith.constant 0 : index
    %c0_0 = arith.constant 0 : index
    %0 = vector.load %arg1[%c0, %c0_0] : memref<16x16xf32, #tpu.memory_space<vmem>>, vector<16x16xf32>
    %c0_1 = arith.constant 0 : index
    %c0_2 = arith.constant 0 : index
    %1 = vector.load %arg3[%c0_1, %c0_2] : memref<16x128xbf16, #tpu.memory_space<vmem>>, vector<16x128xbf16>
    %c0_3 = arith.constant 0 : index
    %c0_4 = arith.constant 0 : index
    %2 = vector.load %arg4[%c0_3, %c0_4] : memref<8x128xbf16, #tpu.memory_space<vmem>>, vector<8x128xbf16>
    %3 = arith.truncf %0 : vector<16x16xf32> to vector<16x16xbf16>
    %cst = arith.constant dense<0.000000e+00> : vector<16x128xf32>
    %4 = tpu.matmul %3, %1, %cst {dimension_numbers = #tpu.dot_dimension_numbers<[1], [0], [0], [1], [0, 0, 1, 1], [], []>} : vector<16x16xbf16>, vector<16x128xbf16>, vector<16x128xf32> -> vector<16x128xf32>
    %c0_5 = arith.constant 0 : index
    %c0_6 = arith.constant 0 : index
    %5 = vector.load %arg2[%c0_5, %c0_6] : memref<16x8xf32, #tpu.memory_space<vmem>>, vector<16x8xf32>
    %6 = arith.truncf %5 : vector<16x8xf32> to vector<16x8xbf16>
    %cst_7 = arith.constant dense<0.000000e+00> : vector<16x128xf32>
    %7 = tpu.matmul %6, %2, %cst_7 {dimension_numbers = #tpu.dot_dimension_numbers<[1], [0], [0], [1], [0, 0, 1, 1], [], []>} : vector<16x8xbf16>, vector<8x128xbf16>, vector<16x128xf32> -> vector<16x128xf32>
    %8 = arith.addf %4, %7 : vector<16x128xf32>
    %c0_8 = arith.constant 0 : index
    %c0_9 = arith.constant 0 : index
    %9 = vector.load %arg5[%c0_8, %c0_9] : memref<1x128xf32, #tpu.memory_space<vmem>>, vector<1x128xf32>
    %10 = vector.broadcast %9 : vector<1x128xf32> to vector<16x128xf32>
    %11 = arith.addf %8, %10 : vector<16x128xf32>
    %12 = math.tanh %11 : vector<16x128xf32>
    %c0_10 = arith.constant 0 : index
    %c0_11 = arith.constant 0 : index
    %13 = vector.load %arg6[%c0_10, %c0_11] : memref<128x16xbf16, #tpu.memory_space<vmem>>, vector<128x16xbf16>
    %14 = arith.truncf %12 : vector<16x128xf32> to vector<16x128xbf16>
    %cst_12 = arith.constant dense<0.000000e+00> : vector<16x16xf32>
    %15 = tpu.matmul %14, %13, %cst_12 {dimension_numbers = #tpu.dot_dimension_numbers<[1], [0], [0], [1], [0, 0, 1, 1], [], []>} : vector<16x128xbf16>, vector<128x16xbf16>, vector<16x16xf32> -> vector<16x16xf32>
    %c0_13 = arith.constant 0 : index
    %c0_14 = arith.constant 0 : index
    %16 = vector.load %arg7[%c0_13, %c0_14] : memref<1x16xf32, #tpu.memory_space<vmem>>, vector<1x16xf32>
    %17 = vector.broadcast %16 : vector<1x16xf32> to vector<16x16xf32>
    %18 = arith.addf %15, %17 : vector<16x16xf32>
    %19 = arith.subf %0, %18 : vector<16x16xf32>
    %c0_15 = arith.constant 0 : index
    %c0_16 = arith.constant 0 : index
    %20 = vector.load %arg8[%c0_15, %c0_16] : memref<16x16xf32, #tpu.memory_space<vmem>>, vector<16x16xf32>
    tpu.vector_store %arg8[%c0_15, %c0_16], %19 {strides = array<i32>} : memref<16x16xf32, #tpu.memory_space<vmem>>, vector<16x16xf32>,
    return
  }
  func.func @transform_0(%arg0: i32) -> (i32, i32) {
    %c0_i32 = arith.constant 0 : i32
    %c0_i32_0 = arith.constant 0 : i32
    return %arg0, %c0_i32 : i32, i32
  }
  func.func @transform_1(%arg0: i32) -> (i32, i32) {
    %c0_i32 = arith.constant 0 : i32
    %c0_i32_0 = arith.constant 0 : i32
    return %arg0, %c0_i32 : i32, i32
  }
  func.func @transform_2(%arg0: i32) -> (i32, i32) {
    %c0_i32 = arith.constant 0 : i32
    %c0_i32_0 = arith.constant 0 : i32
    %c0_i32_1 = arith.constant 0 : i32
    return %c0_i32, %c0_i32_0 : i32, i32
  }
  func.func @transform_3(%arg0: i32) -> (i32, i32) {
    %c0_i32 = arith.constant 0 : i32
    %c0_i32_0 = arith.constant 0 : i32
    %c0_i32_1 = arith.constant 0 : i32
    return %c0_i32, %c0_i32_0 : i32, i32
  }
  func.func @transform_4(%arg0: i32) -> (i32, i32) {
    %c0_i32 = arith.constant 0 : i32
    %c0_i32_0 = arith.constant 0 : i32
    %c0_i32_1 = arith.constant 0 : i32
    return %c0_i32, %c0_i32_0 : i32, i32
  }
  func.func @transform_5(%arg0: i32) -> (i32, i32) {
    %c0_i32 = arith.constant 0 : i32
    %c0_i32_0 = arith.constant 0 : i32
    %c0_i32_1 = arith.constant 0 : i32
    return %c0_i32, %c0_i32_0 : i32, i32
  }
  func.func @transform_6(%arg0: i32) -> (i32, i32) {
    %c0_i32 = arith.constant 0 : i32
    %c0_i32_0 = arith.constant 0 : i32
    %c0_i32_1 = arith.constant 0 : i32
    return %c0_i32, %c0_i32_0 : i32, i32
  }
  func.func @transform_7(%arg0: i32) -> (i32, i32) {
    %c0_i32 = arith.constant 0 : i32
    %c0_i32_0 = arith.constant 0 : i32
    return %arg0, %c0_i32 : i32, i32
  }
}

module attributes {stable_mosaic.version = 11 : i64} {
  func.func @_stft_gain_kernel(%arg0: i32, %arg1: memref<24x16xf32, #tpu.memory_space<vmem>>, %arg2: memref<2x128xf32, #tpu.memory_space<vmem>>, %arg3: memref<64x128xf32, #tpu.memory_space<vmem>>, %arg4: memref<2xf32, #tpu.memory_space<smem>>, %arg5: memref<2x128xf32, #tpu.memory_space<vmem>>) attributes {dimension_semantics = [#tpu.dimension_semantics<arbitrary>], iteration_bounds = array<i64: 1>, scalar_prefetch = 0 : i64, scratch_operands = 0 : i64, tpu.core_type = #tpu.core_type<tc>, window_params = [{pipeline_mode = #tpu.pipeline_mode<synchronous>, transform_indices = @transform_0, window_bounds = array<i64: 24, 16>}, {pipeline_mode = #tpu.pipeline_mode<synchronous>, transform_indices = @transform_1, window_bounds = array<i64: 2, 128>}, {pipeline_mode = #tpu.pipeline_mode<synchronous>, transform_indices = @transform_2, window_bounds = array<i64: 64, 128>}, {transform_indices = @transform_3, window_bounds = array<i64: 2>}, {pipeline_mode = #tpu.pipeline_mode<synchronous>, transform_indices = @transform_4, window_bounds = array<i64: 2, 128>}]} {
    %cst = arith.constant 0.000000e+00 : f32
    %0 = vector.broadcast %cst : f32 to vector<8x128xf32>
    %c0 = arith.constant 0 : index
    %c0_0 = arith.constant 0 : index
    %1 = vector.load %arg1[%c0, %c0_0] : memref<24x16xf32, #tpu.memory_space<vmem>>, vector<8x16xf32>
    %c0_1 = arith.constant 0 : index
    %c0_2 = arith.constant 0 : index
    %2 = vector.load %arg3[%c0_1, %c0_2] : memref<64x128xf32, #tpu.memory_space<vmem>>, vector<16x128xf32>
    %cst_3 = arith.constant dense<0.000000e+00> : vector<8x128xf32>
    %3 = tpu.matmul %1, %2, %cst_3 {dimension_numbers = #tpu.dot_dimension_numbers<[1], [0], [0], [1], [0, 0, 1, 1], [], []>} : vector<8x16xf32>, vector<16x128xf32>, vector<8x128xf32> -> vector<8x128xf32>
    %4 = arith.addf %0, %3 : vector<8x128xf32>
    %c1 = arith.constant 1 : index
    %c0_4 = arith.constant 0 : index
    %5 = vector.load %arg1[%c1, %c0_4] : memref<24x16xf32, #tpu.memory_space<vmem>>, vector<8x16xf32>
    %c16 = arith.constant 16 : index
    %c0_5 = arith.constant 0 : index
    %6 = vector.load %arg3[%c16, %c0_5] : memref<64x128xf32, #tpu.memory_space<vmem>>, vector<16x128xf32>
    %cst_6 = arith.constant dense<0.000000e+00> : vector<8x128xf32>
    %7 = tpu.matmul %5, %6, %cst_6 {dimension_numbers = #tpu.dot_dimension_numbers<[1], [0], [0], [1], [0, 0, 1, 1], [], []>} : vector<8x16xf32>, vector<16x128xf32>, vector<8x128xf32> -> vector<8x128xf32>
    %8 = arith.addf %4, %7 : vector<8x128xf32>
    %c2 = arith.constant 2 : index
    %c0_7 = arith.constant 0 : index
    %9 = vector.load %arg1[%c2, %c0_7] : memref<24x16xf32, #tpu.memory_space<vmem>>, vector<8x16xf32>
    %c32 = arith.constant 32 : index
    %c0_8 = arith.constant 0 : index
    %10 = vector.load %arg3[%c32, %c0_8] : memref<64x128xf32, #tpu.memory_space<vmem>>, vector<16x128xf32>
    %cst_9 = arith.constant dense<0.000000e+00> : vector<8x128xf32>
    %11 = tpu.matmul %9, %10, %cst_9 {dimension_numbers = #tpu.dot_dimension_numbers<[1], [0], [0], [1], [0, 0, 1, 1], [], []>} : vector<8x16xf32>, vector<16x128xf32>, vector<8x128xf32> -> vector<8x128xf32>
    %12 = arith.addf %8, %11 : vector<8x128xf32>
    %c3 = arith.constant 3 : index
    %c0_10 = arith.constant 0 : index
    %13 = vector.load %arg1[%c3, %c0_10] : memref<24x16xf32, #tpu.memory_space<vmem>>, vector<8x16xf32>
    %c48 = arith.constant 48 : index
    %c0_11 = arith.constant 0 : index
    %14 = vector.load %arg3[%c48, %c0_11] : memref<64x128xf32, #tpu.memory_space<vmem>>, vector<16x128xf32>
    %cst_12 = arith.constant dense<0.000000e+00> : vector<8x128xf32>
    %15 = tpu.matmul %13, %14, %cst_12 {dimension_numbers = #tpu.dot_dimension_numbers<[1], [0], [0], [1], [0, 0, 1, 1], [], []>} : vector<8x16xf32>, vector<16x128xf32>, vector<8x128xf32> -> vector<8x128xf32>
    %16 = arith.addf %12, %15 : vector<8x128xf32>
    %17 = arith.mulf %16, %16 : vector<8x128xf32>
    %18 = vector.shape_cast %17 : vector<8x128xf32> to vector<1x8x128xf32>
    %cst_13 = arith.constant dense<0.000000e+00> : vector<1xf32>
    %19 = vector.multi_reduction <add>, %18, %cst_13 [1, 2] : vector<1x8x128xf32> to vector<1xf32>
    %20 = vector.shape_cast %19 : vector<1xf32> to vector<1x1x1xf32>
    %21 = vector.extract %20[0, 0, 0] : f32 from vector<1x1x1xf32>
    %cst_14 = arith.constant 0.0037878789 : f32
    %22 = arith.mulf %21, %cst_14 : f32
    %c0_15 = arith.constant 0 : index
    %23 = memref.load %arg4[%c0_15] : memref<2xf32, #tpu.memory_space<smem>>
    %cst_16 = arith.constant 9.99999993E-9 : f32
    %24 = arith.addf %22, %cst_16 : f32
    %25 = arith.divf %23, %24 : f32
    %26 = math.sqrt %25 : f32
    %c0_17 = arith.constant 0 : index
    %c0_18 = arith.constant 0 : index
    %27 = vector.load %arg2[%c0_17, %c0_18] : memref<2x128xf32, #tpu.memory_space<vmem>>, vector<1x128xf32>
    %28 = vector.broadcast %26 : f32 to vector<1x128xf32>
    %29 = arith.mulf %27, %28 : vector<1x128xf32>
    %c0_19 = arith.constant 0 : index
    %c0_20 = arith.constant 0 : index
    %30 = vector.load %arg5[%c0_19, %c0_20] : memref<2x128xf32, #tpu.memory_space<vmem>>, vector<1x128xf32>
    tpu.vector_store %arg5[%c0_19, %c0_20], %29 {strides = array<i32>} : memref<2x128xf32, #tpu.memory_space<vmem>>, vector<1x128xf32>,
    %cst_21 = arith.constant 0.000000e+00 : f32
    %31 = vector.broadcast %cst_21 : f32 to vector<8x128xf32>
    %c12 = arith.constant 12 : index
    %c0_22 = arith.constant 0 : index
    %32 = vector.load %arg1[%c12, %c0_22] : memref<24x16xf32, #tpu.memory_space<vmem>>, vector<8x16xf32>
    %c0_23 = arith.constant 0 : index
    %c0_24 = arith.constant 0 : index
    %33 = vector.load %arg3[%c0_23, %c0_24] : memref<64x128xf32, #tpu.memory_space<vmem>>, vector<16x128xf32>
    %cst_25 = arith.constant dense<0.000000e+00> : vector<8x128xf32>
    %34 = tpu.matmul %32, %33, %cst_25 {dimension_numbers = #tpu.dot_dimension_numbers<[1], [0], [0], [1], [0, 0, 1, 1], [], []>} : vector<8x16xf32>, vector<16x128xf32>, vector<8x128xf32> -> vector<8x128xf32>
    %35 = arith.addf %31, %34 : vector<8x128xf32>
    %c13 = arith.constant 13 : index
    %c0_26 = arith.constant 0 : index
    %36 = vector.load %arg1[%c13, %c0_26] : memref<24x16xf32, #tpu.memory_space<vmem>>, vector<8x16xf32>
    %c16_27 = arith.constant 16 : index
    %c0_28 = arith.constant 0 : index
    %37 = vector.load %arg3[%c16_27, %c0_28] : memref<64x128xf32, #tpu.memory_space<vmem>>, vector<16x128xf32>
    %cst_29 = arith.constant dense<0.000000e+00> : vector<8x128xf32>
    %38 = tpu.matmul %36, %37, %cst_29 {dimension_numbers = #tpu.dot_dimension_numbers<[1], [0], [0], [1], [0, 0, 1, 1], [], []>} : vector<8x16xf32>, vector<16x128xf32>, vector<8x128xf32> -> vector<8x128xf32>
    %39 = arith.addf %35, %38 : vector<8x128xf32>
    %c14 = arith.constant 14 : index
    %c0_30 = arith.constant 0 : index
    %40 = vector.load %arg1[%c14, %c0_30] : memref<24x16xf32, #tpu.memory_space<vmem>>, vector<8x16xf32>
    %c32_31 = arith.constant 32 : index
    %c0_32 = arith.constant 0 : index
    %41 = vector.load %arg3[%c32_31, %c0_32] : memref<64x128xf32, #tpu.memory_space<vmem>>, vector<16x128xf32>
    %cst_33 = arith.constant dense<0.000000e+00> : vector<8x128xf32>
    %42 = tpu.matmul %40, %41, %cst_33 {dimension_numbers = #tpu.dot_dimension_numbers<[1], [0], [0], [1], [0, 0, 1, 1], [], []>} : vector<8x16xf32>, vector<16x128xf32>, vector<8x128xf32> -> vector<8x128xf32>
    %43 = arith.addf %39, %42 : vector<8x128xf32>
    %c15 = arith.constant 15 : index
    %c0_34 = arith.constant 0 : index
    %44 = vector.load %arg1[%c15, %c0_34] : memref<24x16xf32, #tpu.memory_space<vmem>>, vector<8x16xf32>
    %c48_35 = arith.constant 48 : index
    %c0_36 = arith.constant 0 : index
    %45 = vector.load %arg3[%c48_35, %c0_36] : memref<64x128xf32, #tpu.memory_space<vmem>>, vector<16x128xf32>
    %cst_37 = arith.constant dense<0.000000e+00> : vector<8x128xf32>
    %46 = tpu.matmul %44, %45, %cst_37 {dimension_numbers = #tpu.dot_dimension_numbers<[1], [0], [0], [1], [0, 0, 1, 1], [], []>} : vector<8x16xf32>, vector<16x128xf32>, vector<8x128xf32> -> vector<8x128xf32>
    %47 = arith.addf %43, %46 : vector<8x128xf32>
    %48 = arith.mulf %47, %47 : vector<8x128xf32>
    %49 = vector.shape_cast %48 : vector<8x128xf32> to vector<1x8x128xf32>
    %cst_38 = arith.constant dense<0.000000e+00> : vector<1xf32>
    %50 = vector.multi_reduction <add>, %49, %cst_38 [1, 2] : vector<1x8x128xf32> to vector<1xf32>
    %51 = vector.shape_cast %50 : vector<1xf32> to vector<1x1x1xf32>
    %52 = vector.extract %51[0, 0, 0] : f32 from vector<1x1x1xf32>
    %cst_39 = arith.constant 0.0037878789 : f32
    %53 = arith.mulf %52, %cst_39 : f32
    %c1_40 = arith.constant 1 : index
    %54 = memref.load %arg4[%c1_40] : memref<2xf32, #tpu.memory_space<smem>>
    %cst_41 = arith.constant 9.99999993E-9 : f32
    %55 = arith.addf %53, %cst_41 : f32
    %56 = arith.divf %54, %55 : f32
    %57 = math.sqrt %56 : f32
    %c1_42 = arith.constant 1 : index
    %c0_43 = arith.constant 0 : index
    %58 = vector.load %arg2[%c1_42, %c0_43] : memref<2x128xf32, #tpu.memory_space<vmem>>, vector<1x128xf32>
    %59 = vector.broadcast %57 : f32 to vector<1x128xf32>
    %60 = arith.mulf %58, %59 : vector<1x128xf32>
    %c1_44 = arith.constant 1 : index
    %c0_45 = arith.constant 0 : index
    %61 = vector.load %arg5[%c1_44, %c0_45] : memref<2x128xf32, #tpu.memory_space<vmem>>, vector<1x128xf32>
    tpu.vector_store %arg5[%c1_44, %c0_45], %60 {strides = array<i32>} : memref<2x128xf32, #tpu.memory_space<vmem>>, vector<1x128xf32>,
    return
  }
  func.func @transform_0(%arg0: i32) -> (i32, i32) {
    %c0_i32 = arith.constant 0 : i32
    %c0_i32_0 = arith.constant 0 : i32
    %c0_i32_1 = arith.constant 0 : i32
    return %c0_i32, %c0_i32_0 : i32, i32
  }
  func.func @transform_1(%arg0: i32) -> (i32, i32) {
    %c0_i32 = arith.constant 0 : i32
    %c0_i32_0 = arith.constant 0 : i32
    %c0_i32_1 = arith.constant 0 : i32
    return %c0_i32, %c0_i32_0 : i32, i32
  }
  func.func @transform_2(%arg0: i32) -> (i32, i32) {
    %c0_i32 = arith.constant 0 : i32
    %c0_i32_0 = arith.constant 0 : i32
    %c0_i32_1 = arith.constant 0 : i32
    return %c0_i32, %c0_i32_0 : i32, i32
  }
  func.func @transform_3(%arg0: i32) -> i32 {
    %c0_i32 = arith.constant 0 : i32
    %c0_i32_0 = arith.constant 0 : i32
    return %c0_i32 : i32
  }
  func.func @transform_4(%arg0: i32) -> (i32, i32) {
    %c0_i32 = arith.constant 0 : i32
    %c0_i32_0 = arith.constant 0 : i32
    %c0_i32_1 = arith.constant 0 : i32
    return %c0_i32, %c0_i32_0 : i32, i32
  }
}

module attributes {stable_mosaic.version = 11 : i64} {
  func.func @_stft_gain_kernel(%arg0: i32, %arg1: memref<24x16xf32, #tpu.memory_space<vmem>>, %arg2: memref<2x128xf32, #tpu.memory_space<vmem>>, %arg3: memref<64x128xf32, #tpu.memory_space<vmem>>, %arg4: memref<2xf32, #tpu.memory_space<smem>>, %arg5: memref<2x128xf32, #tpu.memory_space<vmem>>) attributes {dimension_semantics = [#tpu.dimension_semantics<arbitrary>], iteration_bounds = array<i64: 1>, scalar_prefetch = 0 : i64, scratch_operands = 0 : i64, tpu.core_type = #tpu.core_type<tc>, window_params = [{pipeline_mode = #tpu.pipeline_mode<synchronous>, transform_indices = @transform_0, window_bounds = array<i64: 24, 16>}, {pipeline_mode = #tpu.pipeline_mode<synchronous>, transform_indices = @transform_1, window_bounds = array<i64: 2, 128>}, {pipeline_mode = #tpu.pipeline_mode<synchronous>, transform_indices = @transform_2, window_bounds = array<i64: 64, 128>}, {transform_indices = @transform_3, window_bounds = array<i64: 2>}, {pipeline_mode = #tpu.pipeline_mode<synchronous>, transform_indices = @transform_4, window_bounds = array<i64: 2, 128>}]} {
    %cst = arith.constant 0.000000e+00 : f32
    %0 = vector.broadcast %cst : f32 to vector<8x128xf32>
    %c0 = arith.constant 0 : index
    %c0_0 = arith.constant 0 : index
    %1 = vector.load %arg1[%c0, %c0_0] : memref<24x16xf32, #tpu.memory_space<vmem>>, vector<8x16xf32>
    %c0_1 = arith.constant 0 : index
    %c0_2 = arith.constant 0 : index
    %2 = vector.load %arg3[%c0_1, %c0_2] : memref<64x128xf32, #tpu.memory_space<vmem>>, vector<16x128xf32>
    %cst_3 = arith.constant dense<0.000000e+00> : vector<8x128xf32>
    %3 = tpu.matmul %1, %2, %cst_3 {dimension_numbers = #tpu.dot_dimension_numbers<[1], [0], [0], [1], [0, 0, 1, 1], [], []>} : vector<8x16xf32>, vector<16x128xf32>, vector<8x128xf32> -> vector<8x128xf32>
    %4 = arith.addf %0, %3 : vector<8x128xf32>
    %c1 = arith.constant 1 : index
    %c0_4 = arith.constant 0 : index
    %5 = vector.load %arg1[%c1, %c0_4] : memref<24x16xf32, #tpu.memory_space<vmem>>, vector<8x16xf32>
    %c16 = arith.constant 16 : index
    %c0_5 = arith.constant 0 : index
    %6 = vector.load %arg3[%c16, %c0_5] : memref<64x128xf32, #tpu.memory_space<vmem>>, vector<16x128xf32>
    %cst_6 = arith.constant dense<0.000000e+00> : vector<8x128xf32>
    %7 = tpu.matmul %5, %6, %cst_6 {dimension_numbers = #tpu.dot_dimension_numbers<[1], [0], [0], [1], [0, 0, 1, 1], [], []>} : vector<8x16xf32>, vector<16x128xf32>, vector<8x128xf32> -> vector<8x128xf32>
    %8 = arith.addf %4, %7 : vector<8x128xf32>
    %c2 = arith.constant 2 : index
    %c0_7 = arith.constant 0 : index
    %9 = vector.load %arg1[%c2, %c0_7] : memref<24x16xf32, #tpu.memory_space<vmem>>, vector<8x16xf32>
    %c32 = arith.constant 32 : index
    %c0_8 = arith.constant 0 : index
    %10 = vector.load %arg3[%c32, %c0_8] : memref<64x128xf32, #tpu.memory_space<vmem>>, vector<16x128xf32>
    %cst_9 = arith.constant dense<0.000000e+00> : vector<8x128xf32>
    %11 = tpu.matmul %9, %10, %cst_9 {dimension_numbers = #tpu.dot_dimension_numbers<[1], [0], [0], [1], [0, 0, 1, 1], [], []>} : vector<8x16xf32>, vector<16x128xf32>, vector<8x128xf32> -> vector<8x128xf32>
    %12 = arith.addf %8, %11 : vector<8x128xf32>
    %c3 = arith.constant 3 : index
    %c0_10 = arith.constant 0 : index
    %13 = vector.load %arg1[%c3, %c0_10] : memref<24x16xf32, #tpu.memory_space<vmem>>, vector<8x16xf32>
    %c48 = arith.constant 48 : index
    %c0_11 = arith.constant 0 : index
    %14 = vector.load %arg3[%c48, %c0_11] : memref<64x128xf32, #tpu.memory_space<vmem>>, vector<16x128xf32>
    %cst_12 = arith.constant dense<0.000000e+00> : vector<8x128xf32>
    %15 = tpu.matmul %13, %14, %cst_12 {dimension_numbers = #tpu.dot_dimension_numbers<[1], [0], [0], [1], [0, 0, 1, 1], [], []>} : vector<8x16xf32>, vector<16x128xf32>, vector<8x128xf32> -> vector<8x128xf32>
    %16 = arith.addf %12, %15 : vector<8x128xf32>
    %17 = arith.mulf %16, %16 : vector<8x128xf32>
    %18 = vector.shape_cast %17 : vector<8x128xf32> to vector<1x8x128xf32>
    %cst_13 = arith.constant dense<0.000000e+00> : vector<1xf32>
    %19 = vector.multi_reduction <add>, %18, %cst_13 [1, 2] : vector<1x8x128xf32> to vector<1xf32>
    %20 = vector.shape_cast %19 : vector<1xf32> to vector<1x1x1xf32>
    %21 = vector.extract %20[0, 0, 0] : f32 from vector<1x1x1xf32>
    %cst_14 = arith.constant 0.0037878789 : f32
    %22 = arith.mulf %21, %cst_14 : f32
    %c0_15 = arith.constant 0 : index
    %23 = memref.load %arg4[%c0_15] : memref<2xf32, #tpu.memory_space<smem>>
    %cst_16 = arith.constant 9.99999993E-9 : f32
    %24 = arith.addf %22, %cst_16 : f32
    %25 = arith.divf %23, %24 : f32
    %26 = math.sqrt %25 : f32
    %c0_17 = arith.constant 0 : index
    %c0_18 = arith.constant 0 : index
    %27 = vector.load %arg2[%c0_17, %c0_18] : memref<2x128xf32, #tpu.memory_space<vmem>>, vector<1x128xf32>
    %28 = vector.broadcast %26 : f32 to vector<1x128xf32>
    %29 = arith.mulf %27, %28 : vector<1x128xf32>
    %c0_19 = arith.constant 0 : index
    %c0_20 = arith.constant 0 : index
    %30 = vector.load %arg5[%c0_19, %c0_20] : memref<2x128xf32, #tpu.memory_space<vmem>>, vector<1x128xf32>
    tpu.vector_store %arg5[%c0_19, %c0_20], %29 {strides = array<i32>} : memref<2x128xf32, #tpu.memory_space<vmem>>, vector<1x128xf32>,
    %cst_21 = arith.constant 0.000000e+00 : f32
    %31 = vector.broadcast %cst_21 : f32 to vector<8x128xf32>
    %c12 = arith.constant 12 : index
    %c0_22 = arith.constant 0 : index
    %32 = vector.load %arg1[%c12, %c0_22] : memref<24x16xf32, #tpu.memory_space<vmem>>, vector<8x16xf32>
    %c0_23 = arith.constant 0 : index
    %c0_24 = arith.constant 0 : index
    %33 = vector.load %arg3[%c0_23, %c0_24] : memref<64x128xf32, #tpu.memory_space<vmem>>, vector<16x128xf32>
    %cst_25 = arith.constant dense<0.000000e+00> : vector<8x128xf32>
    %34 = tpu.matmul %32, %33, %cst_25 {dimension_numbers = #tpu.dot_dimension_numbers<[1], [0], [0], [1], [0, 0, 1, 1], [], []>} : vector<8x16xf32>, vector<16x128xf32>, vector<8x128xf32> -> vector<8x128xf32>
    %35 = arith.addf %31, %34 : vector<8x128xf32>
    %c13 = arith.constant 13 : index
    %c0_26 = arith.constant 0 : index
    %36 = vector.load %arg1[%c13, %c0_26] : memref<24x16xf32, #tpu.memory_space<vmem>>, vector<8x16xf32>
    %c16_27 = arith.constant 16 : index
    %c0_28 = arith.constant 0 : index
    %37 = vector.load %arg3[%c16_27, %c0_28] : memref<64x128xf32, #tpu.memory_space<vmem>>, vector<16x128xf32>
    %cst_29 = arith.constant dense<0.000000e+00> : vector<8x128xf32>
    %38 = tpu.matmul %36, %37, %cst_29 {dimension_numbers = #tpu.dot_dimension_numbers<[1], [0], [0], [1], [0, 0, 1, 1], [], []>} : vector<8x16xf32>, vector<16x128xf32>, vector<8x128xf32> -> vector<8x128xf32>
    %39 = arith.addf %35, %38 : vector<8x128xf32>
    %c14 = arith.constant 14 : index
    %c0_30 = arith.constant 0 : index
    %40 = vector.load %arg1[%c14, %c0_30] : memref<24x16xf32, #tpu.memory_space<vmem>>, vector<8x16xf32>
    %c32_31 = arith.constant 32 : index
    %c0_32 = arith.constant 0 : index
    %41 = vector.load %arg3[%c32_31, %c0_32] : memref<64x128xf32, #tpu.memory_space<vmem>>, vector<16x128xf32>
    %cst_33 = arith.constant dense<0.000000e+00> : vector<8x128xf32>
    %42 = tpu.matmul %40, %41, %cst_33 {dimension_numbers = #tpu.dot_dimension_numbers<[1], [0], [0], [1], [0, 0, 1, 1], [], []>} : vector<8x16xf32>, vector<16x128xf32>, vector<8x128xf32> -> vector<8x128xf32>
    %43 = arith.addf %39, %42 : vector<8x128xf32>
    %c15 = arith.constant 15 : index
    %c0_34 = arith.constant 0 : index
    %44 = vector.load %arg1[%c15, %c0_34] : memref<24x16xf32, #tpu.memory_space<vmem>>, vector<8x16xf32>
    %c48_35 = arith.constant 48 : index
    %c0_36 = arith.constant 0 : index
    %45 = vector.load %arg3[%c48_35, %c0_36] : memref<64x128xf32, #tpu.memory_space<vmem>>, vector<16x128xf32>
    %cst_37 = arith.constant dense<0.000000e+00> : vector<8x128xf32>
    %46 = tpu.matmul %44, %45, %cst_37 {dimension_numbers = #tpu.dot_dimension_numbers<[1], [0], [0], [1], [0, 0, 1, 1], [], []>} : vector<8x16xf32>, vector<16x128xf32>, vector<8x128xf32> -> vector<8x128xf32>
    %47 = arith.addf %43, %46 : vector<8x128xf32>
    %48 = arith.mulf %47, %47 : vector<8x128xf32>
    %49 = vector.shape_cast %48 : vector<8x128xf32> to vector<1x8x128xf32>
    %cst_38 = arith.constant dense<0.000000e+00> : vector<1xf32>
    %50 = vector.multi_reduction <add>, %49, %cst_38 [1, 2] : vector<1x8x128xf32> to vector<1xf32>
    %51 = vector.shape_cast %50 : vector<1xf32> to vector<1x1x1xf32>
    %52 = vector.extract %51[0, 0, 0] : f32 from vector<1x1x1xf32>
    %cst_39 = arith.constant 0.0037878789 : f32
    %53 = arith.mulf %52, %cst_39 : f32
    %c1_40 = arith.constant 1 : index
    %54 = memref.load %arg4[%c1_40] : memref<2xf32, #tpu.memory_space<smem>>
    %cst_41 = arith.constant 9.99999993E-9 : f32
    %55 = arith.addf %53, %cst_41 : f32
    %56 = arith.divf %54, %55 : f32
    %57 = math.sqrt %56 : f32
    %c1_42 = arith.constant 1 : index
    %c0_43 = arith.constant 0 : index
    %58 = vector.load %arg2[%c1_42, %c0_43] : memref<2x128xf32, #tpu.memory_space<vmem>>, vector<1x128xf32>
    %59 = vector.broadcast %57 : f32 to vector<1x128xf32>
    %60 = arith.mulf %58, %59 : vector<1x128xf32>
    %c1_44 = arith.constant 1 : index
    %c0_45 = arith.constant 0 : index
    %61 = vector.load %arg5[%c1_44, %c0_45] : memref<2x128xf32, #tpu.memory_space<vmem>>, vector<1x128xf32>
    tpu.vector_store %arg5[%c1_44, %c0_45], %60 {strides = array<i32>} : memref<2x128xf32, #tpu.memory_space<vmem>>, vector<1x128xf32>,
    return
  }
  func.func @transform_0(%arg0: i32) -> (i32, i32) {
    %c0_i32 = arith.constant 0 : i32
    %c0_i32_0 = arith.constant 0 : i32
    %c0_i32_1 = arith.constant 0 : i32
    return %c0_i32, %c0_i32_0 : i32, i32
  }
  func.func @transform_1(%arg0: i32) -> (i32, i32) {
    %c0_i32 = arith.constant 0 : i32
    %c0_i32_0 = arith.constant 0 : i32
    %c0_i32_1 = arith.constant 0 : i32
    return %c0_i32, %c0_i32_0 : i32, i32
  }
  func.func @transform_2(%arg0: i32) -> (i32, i32) {
    %c0_i32 = arith.constant 0 : i32
    %c0_i32_0 = arith.constant 0 : i32
    %c0_i32_1 = arith.constant 0 : i32
    return %c0_i32, %c0_i32_0 : i32, i32
  }
  func.func @transform_3(%arg0: i32) -> i32 {
    %c0_i32 = arith.constant 0 : i32
    %c0_i32_0 = arith.constant 0 : i32
    return %c0_i32 : i32
  }
  func.func @transform_4(%arg0: i32) -> (i32, i32) {
    %c0_i32 = arith.constant 0 : i32
    %c0_i32_0 = arith.constant 0 : i32
    %c0_i32_1 = arith.constant 0 : i32
    return %c0_i32, %c0_i32_0 : i32, i32
  }
}

</mosaic_0001>

<bundles_post_ra>
// kernel: _lambda_.4
= control target key start
LH: loop header
LB: loop body
LE: loop exit
PB: predicated region body
PF: predicated region fallthrough
CT: control target
= control target key end

     0   :  { %vm40_vm0 = vcmask 1043456   ;;  %vm36_vm1 = vcmask 64512   ;;  %vm64_vm2 = vcmask 130048   ;;  %s331_s3 = inlined_call_operand.vmem [shape: bf16[8,128], index: 3, kind: input, shape index: {}]   ;;  %s332_s2 = inlined_call_operand.vmem [shape: bf16[16,128], index: 2, kind: input, shape index: {}]   ;;  %s333_s1 = inlined_call_operand.vmem [shape: f32[16,8], index: 1, kind: input, shape index: {}]   ;;  %s334_s0 = inlined_call_operand.vmem [shape: f32[16,16], index: 0, kind: input, shape index: {}]   ;;  %s335_s5 = inlined_call_operand.vmem [shape: bf16[128,16], index: 5, kind: input, shape index: {}]   ;;  %s336_s4 = inlined_call_operand.vmem [shape: f32[1,128], index: 4, kind: input, shape index: {}]   ;;  %s337_s6 = inlined_call_operand.vmem [shape: f32[1,16], index: 6, kind: input, shape index: {}]   ;;  %s338_s7 = inlined_call_operand.vmem [shape: f32[16,16], index: 7, kind: output, shape index: {}]  }
   0x1   :  { %v31_v0 = vld [vmem:[%s331_s3] sm:$0xf]  ;;  %v34_v4 = vld [vmem:[%s333_s1 + $0x8] sm:$0xff]  ;;  %v227_v9 = vld [vmem:[%s335_s5 + $0x38] sm:$0xff] }
   0x2   :  { %v219_v1 = vld [vmem:[%s332_s2] sm:$0xff]  ;;  %v42_v3 = vsel %vm40_vm0, %v31_v0, 0  ;;  %v28_v6 = vld [vmem:[%s334_s0 + $0x8] sm:$0xff]  ;;  %159 = vmatpush.bf16.msra.mxu2 %v227_v9  ;;  %v226_v10 = vld [vmem:[%s335_s5 + $0x30] sm:$0xff] }
   0x3   :  { %v33_v2 = vld [vmem:[%s333_s1] sm:$0xff]  ;;  %51 = vmatpush.bf16.msra.mxu0 %v42_v3  ;;  %75 = vmatpush.bf16.msra.mxu1 %v219_v1  ;;  %v225_v11 = vld [vmem:[%s335_s5 + $0x28] sm:$0xff]  ;;  %v223_v13 = vld [vmem:[%s335_s5 + $0x18] sm:$0xff] }
   0x4   :  { %v27_v5 = vld [vmem:[%s334_s0] sm:$0xff]  ;;  %v35_v7 = vpack.c.bf16 %v34_v4, %v33_v2  ;;  %v222_v14 = vld [vmem:[%s335_s5 + $0x10] sm:$0xff]  ;;  %v221_v15 = vld [vmem:[%s335_s5 + $0x8] sm:$0xff] }
   0x5   :  { %v32_v8 = vpack.c.bf16 %v28_v6, %v27_v5  ;;  %v224_v12 = vld [vmem:[%s335_s5 + $0x20] sm:$0xff] }
   0x6   :  { %181 = vmatmul.msk.bf16.vlgmr.msra.gmra.mxu0 %vm36_vm1, %v35_v7  ;;  %160 = vmatpush.bf16.msra.mxu2 %v226_v10  ;;  %v220_v16 = vld [vmem:[%s335_s5] sm:$0xff] }
   0x7   :  { %186 = vmatmul.msk.bf16.vlgmr.msra.gmra.mxu1 %vm64_vm2, %v32_v8  ;;  %v228_v20 = vld [vmem:[%s336_s4] ss:$0 sm:$0xff] }
   0x8   :  { %v229_v29 = vld [vmem:[%s337_s6] ss:$0 sm:$0xff] }
   0xa   :  { %161 = vmatpush.bf16.msra.mxu2 %v225_v11 }
   0xe   :  { %162 = vmatpush.bf16.msra.mxu2 %v224_v12 }
  0x12   :  { %163 = vmatpush.bf16.msra.mxu2 %v223_v13 }
  0x16   :  { %164 = vmatpush.bf16.msra.mxu2 %v222_v14 }
  0x1a   :  { %165 = vmatpush.bf16.msra.mxu2 %v221_v15 }
  0x1e   :  { %166 = vmatpush.bf16.msra.mxu2 %v220_v16 }
  0x83   :  { %v53_v17 = vpop.f32.mrf.mxu0 }
  0x84   :  { %v77_v18 = vpop.f32.mrf.mxu1 }
  0x85   :  { %v78_v19 = vadd.f32 %v77_v18, %v53_v17 }
  0x87   :  { %v86_v21 = vadd.f32 %v228_v20, %v78_v19 }
  0x89   :  { %230 = vtanh.f32 %v86_v21 }
  0x8b   :  { %v55_v22 = vpop.f32.mrf.mxu0 }
  0x8c   :  { %v79_v23 = vpop.f32.mrf.mxu1 }
  0x8d   :  { %v80_v24 = vadd.f32 %v79_v23, %v55_v22 }
  0x8f   :  { %v87_v25 = vadd.f32 %v228_v20, %v80_v24  ;;  %v231_v26 = vpop.eup %230 }
  0x91   :  { %232 = vtanh.f32 %v87_v25 }
  0x97   :  { %v233_v27 = vpop.eup %232 }
  0x98   :  { %v106_v28 = vpack.c.bf16 %v233_v27, %v231_v26 }
  0x9a   :  { %167 = vmatmul.bf16.vlgmr.msra.gmra.mxu2 %v106_v28 }
 0x11d   :  { %v168_v30 = vpop.f32.mrf.mxu2 }
 0x11e   :  { %v169_v31 = vadd.f32 %v229_v29, %v168_v30 }
 0x120   :  { %v173_v32 = vsub.f32 %v27_v5, %v169_v31 }
 0x122   :  { %175 = vst.msk [vmem:[%s338_s7] sm:$0xff] %vm64_vm2, %v173_v32 }
 0x125   :  { %v170_v33 = vpop.f32.mrf.mxu2 }
 0x126   :  { %v171_v34 = vadd.f32 %v229_v29, %v170_v33 }
 0x128   :  { %v174_v35 = vsub.f32 %v28_v6, %v171_v34 }
 0x12a   :  { %176 = vst.msk [vmem:[%s338_s7 + $0x8] sm:$0xff] %vm64_vm2, %v174_v35 }

// kernel: _lambda_.5
= control target key start
LH: loop header
LB: loop body
LE: loop exit
PB: predicated region body
PF: predicated region fallthrough
CT: control target
= control target key end

     0   :  { %9 = vsyncpa [#allocation3], 0  ;;  %s388_s18 = smov [#allocation2]   ;;  %s485_s0 = inlined_call_operand.vmem [shape: f32[24,16], index: 0, kind: input, shape index: {}]   ;;  %s486_s1 = inlined_call_operand.vmem [shape: f32[2,128], index: 1, kind: input, shape index: {}]   ;;  %s487_s2 = inlined_call_operand.vmem [shape: f32[64,128], index: 2, kind: input, shape index: {}]   ;;  %s488_s3 = inlined_call_operand.vmem [shape: f32[2], index: 3, kind: input, shape index: {}]   ;;  %s489_s4 = inlined_call_operand.vmem [shape: f32[2,128], index: 4, kind: output, shape index: {}]  }
   0x1   :  { %s21_s17 = sshll.u32 %s488_s3, 4  ;;  %s22_s17 = int_to_ptr.vmem [resolvable:$true] %s21_s17 }
   0x2   :  { %24 = dma.vmem_to_smem %s22_s17, 16, %s388_s18, [#allocation3]  }
   0x3   :  { %386 = dma.done.wait [#allocation3], 16  }
   0x4   :  { %387 = vsyncadd [#allocation3], 4294967280 }
   0x5   :  { %29 = sfence }
   0x6   :  { %v85_v0 = vld [vmem:[%s487_s2 + $0x28] sm:$0xff]  ;;  %v84_v1 = vld [vmem:[%s487_s2 + $0x20] sm:$0xff]  ;;  %v112_v2 = vld [vmem:[%s487_s2 + $0x38] sm:$0xff]  ;;  %vm36_vm0 = vcmask 130048   ;;  %s148_s3 = sld [smem:[#allocation2]] }
   0x7   :  { %103 = vmatpush.msra.mxu2 %v85_v0  ;;  %130 = vmatpush.msra.mxu3 %v112_v2  ;;  %v83_v3 = vld [vmem:[%s485_s0 + $0x2] sm:$0xff]  ;;  %v35_v4 = vld [vmem:[%s487_s2 + $0x18] sm:$0xff]  ;;  %v111_v6 = vld [vmem:[%s487_s2 + $0x30] sm:$0xff]  ;;  %s352_s9 = sld [smem:[#allocation2 + $0x1]] }
   0x8   :  { %v32_v5 = vld [vmem:[%s487_s2 + $0x8] sm:$0xff]  ;;  %54 = vmatpush.msra.mxu0 %v35_v4  ;;  %v34_v8 = vld [vmem:[%s487_s2 + $0x10] sm:$0xff]  ;;  %v31_v9 = vld [vmem:[%s487_s2] sm:$0xff] }
   0x9   :  { %77 = vmatpush.msra.mxu1 %v32_v5  ;;  %v110_v7 = vld [vmem:[%s485_s0 + $0x3] sm:$0xff]  ;;  %104 = vmatpush.msra.mxu2 %v84_v1  ;;  %v237_v12 = vld [vmem:[%s485_s0 + $0xe] sm:$0xff] }
   0xa   :  { %131 = vmatpush.msra.mxu3 %v111_v6  ;;  %v33_v10 = vld [vmem:[%s485_s0 + $0x1] sm:$0xff]  ;;  %346 = vmatmul.msk.f32.vlgmr.msra.gmra.mxu2 %vm36_vm0, %v83_v3  ;;  %v264_v13 = vld [vmem:[%s485_s0 + $0xf] sm:$0xff] }
   0xb   :  { %v30_v11 = vld [vmem:[%s485_s0] sm:$0xff]  ;;  %347 = vmatmul.msk.f32.vlgmr.msra.gmra.mxu3 %vm36_vm0, %v110_v7  ;;  %55 = vmatpush.msra.mxu0 %v34_v8  ;;  %v188_v14 = vld [vmem:[%s485_s0 + $0xd] sm:$0xff] }
   0xc   :  { %78 = vmatpush.msra.mxu1 %v31_v9  ;;  %344 = vmatmul.msk.f32.vlgmr.msra.gmra.mxu0 %vm36_vm0, %v33_v10  ;;  %v185_v15 = vld [vmem:[%s485_s0 + $0xc] sm:$0xff] }
   0xd   :  { %345 = vmatmul.msk.f32.vlgmr.msra.gmra.mxu1 %vm36_vm0, %v30_v11  ;;  %257 = vmatpush.msrb.mxu2 %v85_v0 }
   0xe   :  { %284 = vmatpush.msrb.mxu3 %v112_v2  ;;  %208 = vmatpush.msrb.mxu0 %v35_v4  ;;  %v181_v4 = vld [vmem:[%s486_s1] sm:$0x1] }
   0xf   :  { %231 = vmatpush.msrb.mxu1 %v32_v5  ;;  %258 = vmatpush.msrb.mxu2 %v84_v1 }
  0x10   :  { %285 = vmatpush.msrb.mxu3 %v111_v6  ;;  %209 = vmatpush.msrb.mxu0 %v34_v8 }
  0x11   :  { %232 = vmatpush.msrb.mxu1 %v31_v9 }
  0x12   :  { %350 = vmatmul.msk.f32.vlgmr.msrb.gmra.mxu2 %vm36_vm0, %v237_v12 }
  0x13   :  { %351 = vmatmul.msk.f32.vlgmr.msrb.gmra.mxu3 %vm36_vm0, %v264_v13 }
  0x14   :  { %348 = vmatmul.msk.f32.vlgmr.msrb.gmra.mxu0 %vm36_vm0, %v188_v14 }
  0x15   :  { %349 = vmatmul.msk.f32.vlgmr.msrb.gmra.mxu1 %vm36_vm0, %v185_v15 }
  0x89   :  { %v57_v16 = vpop.f32.mrf.mxu0 }
  0x8a   :  { %v80_v17 = vpop.f32.mrf.mxu1 }
  0x8b   :  { %v81_v18 = vadd.f32 %v80_v17, %v57_v16 }
  0x8d   :  { %v106_v19 = vpop.f32.mrf.mxu2 }
  0x8e   :  { %v133_v20 = vpop.f32.mrf.mxu3  ;;  %v109_v21 = vadd.f32 %v106_v19, %v81_v18 }
  0x90   :  { %v136_v22 = vadd.f32 %v133_v20, %v109_v21 }
  0x91   :  { %v211_v24 = vpop.f32.mrf.mxu0 }
  0x92   :  { %v137_v23 = vmul.f32 %v136_v22, %v136_v22  ;;  %v234_v25 = vpop.f32.mrf.mxu1 }
  0x93   :  { %v235_v26 = vadd.f32 %v234_v25, %v211_v24 }
  0x94   :  { %138 = vadd.xlane.f32.xlu0 %v137_v23 }
  0x95   :  { %v260_v27 = vpop.f32.mrf.mxu2 }
  0x96   :  { %v287_v28 = vpop.f32.mrf.mxu3  ;;  %v263_v29 = vadd.f32 %v260_v27, %v235_v26 }
  0x98   :  { %v290_v30 = vadd.f32 %v287_v28, %v263_v29  ;;  %v335_v29 = vld [vmem:[%s486_s1 + $0x1] sm:$0x1] }
  0x9a   :  { %v291_v31 = vmul.f32 %v290_v30, %v290_v30 }
  0x9c   :  { %292 = vadd.xlane.f32.xlu0 %v291_v31 }
 0x107   :  { %v139_v32 = vpop.xlane.xlu0 %138 }
 0x108   :  { %v140_v33 = vrot.slane %v139_v32, 4 }
 0x10a   :  { %v141_v34 = vadd.f32 %v140_v33, %v139_v32 }
 0x10c   :  { %v142_v35 = vrot.slane %v141_v34, 2 }
 0x10e   :  { %v143_v36 = vadd.f32 %v142_v35, %v141_v34 }
 0x10f   :  { %v293_v50 = vpop.xlane.xlu0 %292 }
 0x110   :  { %v144_v37 = vrot.slane %v143_v36, 1  ;;  %v294_v52 = vrot.slane %v293_v50, 4 }
 0x112   :  { %v145_v38 = vadd.f32 %v144_v37, %v143_v36  ;;  %v295_v53 = vadd.f32 %v294_v52, %v293_v50 }
 0x114   :  { %353 = vpush %v145_v38  ;;  %v296_v56 = vrot.slane %v295_v53, 2 }
 0x116   :  { %v297_v59 = vadd.f32 %v296_v56, %v295_v53 }
 0x118   :  { %v298_v62 = vrot.slane %v297_v59, 1 }
 0x11a   :  { %v299_v3 = vadd.f32 %v298_v62, %v297_v59 }
 0x145   :  { %s354_s0 = spop %353 }
 0x146   :  { %s147_s23 = smul.f32 0.003787879, %s354_s0 }
 0x148   :  { %s149_s24 = sadd.f32 1e-08, %s147_s23 }
 0x14a   :  { %v150_v39 = vstv %s149_s24 }
 0x14b   :  { %366 = vrcp.f32 %v150_v39  ;;  %v162_v43 = vand.u32 2147483648, %v150_v39  ;;  %v160_v45 = vand.u32 2147483647, %v150_v39  ;;  %vm156_vm2 = vweird.f32 %v150_v39 }
 0x14d   :  { %v163_v47 = vor.u32 1.1754944e-38, %v162_v43  ;;  %vm161_vm4 = vcmp.eq.f32.partialorder %v160_v45, 8.507059e+37 }
 0x151   :  { %v367_v40 = vpop.eup %366 }
 0x152   :  { %v152_v41 = vmul.f32 %v367_v40, %v150_v39  ;;  %vm157_vm1 = vweird.f32 %v367_v40 }
 0x153   :  { %vm158_vm3 = vmor %vm156_vm2, %vm157_vm1 }
 0x154   :  { %v153_v42 = vsub.f32 1.0, %v152_v41 }
 0x156   :  { %v154_v44 = vmul.f32 %v367_v40, %v153_v42 }
 0x158   :  { %v155_v46 = vadd.f32 %v367_v40, %v154_v44 }
 0x15a   :  { %v159_v48 = vsel %vm158_vm3, %v367_v40, %v155_v46 }
 0x15b   :  { %v164_v49 = vsel %vm161_vm4, %v163_v47, %v159_v48 }
 0x15c   :  { %355 = vpush %v164_v49 }
 0x18d   :  { %s356_s25 = spop %355 }
 0x18e   :  { %s166_s26 = smul.f32 %s356_s25, %s148_s3 }
 0x190   :  { %v167_v51 = vstv %s166_s26 }
 0x191   :  { %368 = vrsqrt.f32 %v167_v51  ;;  %vm175_vm5 = vcmp.eq.f32.partialorder %v167_v51, inf  ;;  %v178_v0 = vand.u32 2147483648, %v167_v51  ;;  %vm177_vm6 = vcmp.eq.f32.partialorder %v167_v51, 0.0 }
 0x197   :  { %v369_v54 = vpop.eup %368 }
 0x198   :  { %v169_v55 = vmul.f32 %v369_v54, %v167_v51 }
 0x19a   :  { %v170_v57 = vmul.f32 %v369_v54, %v169_v55 }
 0x19c   :  { %v171_v58 = vmul.f32 0.5, %v170_v57 }
 0x19e   :  { %v172_v60 = vsub.f32 1.5, %v171_v58 }
 0x1a0   :  { %v173_v61 = vmul.f32 %v369_v54, %v172_v60 }
 0x1a2   :  { %v174_v63 = vmul.f32 %v173_v61, %v167_v51 }
 0x1a4   :  { %v176_v1 = vsel %vm175_vm5, %v167_v51, %v174_v63 }
 0x1a5   :  { %v179_v2 = vsel %vm177_vm6, %v178_v0, %v176_v1 }
 0x1a6   :  { %357 = vpush %v179_v2 }
 0x1a7   :  { %359 = vpush %v299_v3 }
 0x1d7   :  { %s358_s29 = spop %357 }
 0x1d8   :  { %v182_v5 = vstv %s358_s29  ;;  %s360_s30 = spop %359 }
 0x1d9   :  { %v183_v6 = vmul.f32 %v182_v5, %v181_v4  ;;  %s301_s5 = smul.f32 0.003787879, %s360_s30 }
 0x1db   :  { %184 = vst [vmem:[%s489_s4] sm:$0x1] %v183_v6  ;;  %s303_s8 = sadd.f32 1e-08, %s301_s5 }
 0x1dd   :  { %v304_v7 = vstv %s303_s8 }
 0x1de   :  { %370 = vrcp.f32 %v304_v7  ;;  %v316_v11 = vand.u32 2147483648, %v304_v7  ;;  %v314_v13 = vand.u32 2147483647, %v304_v7  ;;  %vm310_vm8 = vweird.f32 %v304_v7 }
 0x1e0   :  { %v317_v15 = vor.u32 1.1754944e-38, %v316_v11  ;;  %vm315_vm10 = vcmp.eq.f32.partialorder %v314_v13, 8.507059e+37 }
 0x1e4   :  { %v371_v8 = vpop.eup %370 }
 0x1e5   :  { %v306_v9 = vmul.f32 %v371_v8, %v304_v7  ;;  %vm311_vm7 = vweird.f32 %v371_v8 }
 0x1e6   :  { %vm312_vm9 = vmor %vm310_vm8, %vm311_vm7 }
 0x1e7   :  { %v307_v10 = vsub.f32 1.0, %v306_v9 }
 0x1e9   :  { %v308_v12 = vmul.f32 %v371_v8, %v307_v10 }
 0x1eb   :  { %v309_v14 = vadd.f32 %v371_v8, %v308_v12 }
 0x1ed   :  { %v313_v16 = vsel %vm312_vm9, %v371_v8, %v309_v14 }
 0x1ee   :  { %v318_v17 = vsel %vm315_vm10, %v317_v15, %v313_v16 }
 0x1ef   :  { %361 = vpush %v318_v17 }
 0x220   :  { %s362_s10 = spop %361 }
 0x221   :  { %s320_s11 = smul.f32 %s362_s10, %s352_s9 }
 0x223   :  { %v321_v18 = vstv %s320_s11 }
 0x224   :  { %372 = vrsqrt.f32 %v321_v18  ;;  %vm329_vm11 = vcmp.eq.f32.partialorder %v321_v18, inf  ;;  %v332_v26 = vand.u32 2147483648, %v321_v18  ;;  %vm331_vm12 = vcmp.eq.f32.partialorder %v321_v18, 0.0 }
 0x22a   :  { %v373_v19 = vpop.eup %372 }
 0x22b   :  { %v323_v20 = vmul.f32 %v373_v19, %v321_v18 }
 0x22d   :  { %v324_v21 = vmul.f32 %v373_v19, %v323_v20 }
 0x22f   :  { %v325_v22 = vmul.f32 0.5, %v324_v21 }
 0x231   :  { %v326_v23 = vsub.f32 1.5, %v325_v22 }
 0x233   :  { %v327_v24 = vmul.f32 %v373_v19, %v326_v23 }
 0x235   :  { %v328_v25 = vmul.f32 %v327_v24, %v321_v18 }
 0x237   :  { %v330_v27 = vsel %vm329_vm11, %v321_v18, %v328_v25 }
 0x238   :  { %v333_v28 = vsel %vm331_vm12, %v332_v26, %v330_v27 }
 0x239   :  { %363 = vpush %v333_v28 }
 0x26a   :  { %s364_s14 = spop %363 }
 0x26b   :  { %v336_v30 = vstv %s364_s14 }
 0x26c   :  { %v337_v31 = vmul.f32 %v336_v30, %v335_v29 }
 0x26e   :  { %338 = vst [vmem:[%s489_s4 + $0x1] sm:$0x1] %v337_v31 }
 0x26f   :  { %343 = vsyncpa [#allocation3], 1 }

// kernel: _lambda_.7
= control target key start
LH: loop header
LB: loop body
LE: loop exit
PB: predicated region body
PF: predicated region fallthrough
CT: control target
= control target key end

     0   :  { %9 = vsyncpa [#allocation4], 0  ;;  %s523_s0 = inlined_call_operand.vmem [shape: f32[24,16], index: 0, kind: input, shape index: {}]   ;;  %s524_s1 = inlined_call_operand.vmem [shape: f32[2,128], index: 1, kind: input, shape index: {}]   ;;  %s525_s2 = inlined_call_operand.vmem [shape: f32[64,128], index: 2, kind: input, shape index: {}]   ;;  %s526_s3 = inlined_call_operand.vmem [shape: f32[2], index: 3, kind: input, shape index: {}]   ;;  %s527_s4 = inlined_call_operand.hbm [shape: f32[2,128], index: 4, kind: output, shape index: {}]  }
   0x1   :  { %10 = vsyncpa [#allocation3], 0  ;;  %s22_s17 = sshll.u32 %s526_s3, 4  ;;  %s428_s18 = smov [#allocation2]   ;;  %s23_s17 = int_to_ptr.vmem [resolvable:$true] %s22_s17 }
   0x2   :  { %25 = dma.vmem_to_smem %s23_s17, 16, %s428_s18, [#allocation4]  }
   0x3   :  { %424 = dma.done.wait [#allocation4], 16  }
   0x4   :  { %425 = vsyncadd [#allocation4], 4294967280 }
   0x5   :  { %30 = sfence }
   0x6   :  { %v86_v0 = vld [vmem:[%s525_s2 + $0x28] sm:$0xff]  ;;  %v85_v1 = vld [vmem:[%s525_s2 + $0x20] sm:$0xff]  ;;  %v113_v2 = vld [vmem:[%s525_s2 + $0x38] sm:$0xff]  ;;  %vm37_vm0 = vcmask 130048   ;;  %s149_s3 = sld [smem:[#allocation2]]  ;;  %s429_s12 = smov [#allocation5]  }
   0x7   :  { %104 = vmatpush.msra.mxu2 %v86_v0  ;;  %131 = vmatpush.msra.mxu3 %v113_v2  ;;  %v84_v3 = vld [vmem:[%s523_s0 + $0x2] sm:$0xff]  ;;  %v36_v4 = vld [vmem:[%s525_s2 + $0x18] sm:$0xff]  ;;  %v112_v6 = vld [vmem:[%s525_s2 + $0x30] sm:$0xff]  ;;  %s365_s7 = sld [smem:[#allocation2 + $0x1]]  ;;  %s345_s13 = sshll.u32 %s429_s12, 4  ;;  %s346_s13 = int_to_ptr.vmem [resolvable:$true] %s345_s13 }
   0x8   :  { %v33_v5 = vld [vmem:[%s525_s2 + $0x8] sm:$0xff]  ;;  %55 = vmatpush.msra.mxu0 %v36_v4  ;;  %v35_v8 = vld [vmem:[%s525_s2 + $0x10] sm:$0xff]  ;;  %v32_v9 = vld [vmem:[%s525_s2] sm:$0xff]  ;;  %s347_s2 = sshll.u32 %s527_s4, 4  ;;  %s348_s2 = int_to_ptr.hbm [resolvable:$true] %s347_s2 }
   0x9   :  { %78 = vmatpush.msra.mxu1 %v33_v5  ;;  %v111_v7 = vld [vmem:[%s523_s0 + $0x3] sm:$0xff]  ;;  %105 = vmatpush.msra.mxu2 %v85_v1  ;;  %v238_v12 = vld [vmem:[%s523_s0 + $0xe] sm:$0xff] }
   0xa   :  { %132 = vmatpush.msra.mxu3 %v112_v6  ;;  %v34_v10 = vld [vmem:[%s523_s0 + $0x1] sm:$0xff]  ;;  %359 = vmatmul.msk.f32.vlgmr.msra.gmra.mxu2 %vm37_vm0, %v84_v3  ;;  %v265_v13 = vld [vmem:[%s523_s0 + $0xf] sm:$0xff] }
   0xb   :  { %v31_v11 = vld [vmem:[%s523_s0] sm:$0xff]  ;;  %360 = vmatmul.msk.f32.vlgmr.msra.gmra.mxu3 %vm37_vm0, %v111_v7  ;;  %56 = vmatpush.msra.mxu0 %v35_v8  ;;  %v189_v14 = vld [vmem:[%s523_s0 + $0xd] sm:$0xff] }
   0xc   :  { %79 = vmatpush.msra.mxu1 %v32_v9  ;;  %357 = vmatmul.msk.f32.vlgmr.msra.gmra.mxu0 %vm37_vm0, %v34_v10  ;;  %v186_v15 = vld [vmem:[%s523_s0 + $0xc] sm:$0xff] }
   0xd   :  { %358 = vmatmul.msk.f32.vlgmr.msra.gmra.mxu1 %vm37_vm0, %v31_v11  ;;  %258 = vmatpush.msrb.mxu2 %v86_v0 }
   0xe   :  { %285 = vmatpush.msrb.mxu3 %v113_v2  ;;  %209 = vmatpush.msrb.mxu0 %v36_v4  ;;  %v182_v4 = vld [vmem:[%s524_s1] sm:$0x1] }
   0xf   :  { %232 = vmatpush.msrb.mxu1 %v33_v5  ;;  %259 = vmatpush.msrb.mxu2 %v85_v1 }
  0x10   :  { %286 = vmatpush.msrb.mxu3 %v112_v6  ;;  %210 = vmatpush.msrb.mxu0 %v35_v8 }
  0x11   :  { %233 = vmatpush.msrb.mxu1 %v32_v9 }
  0x12   :  { %363 = vmatmul.msk.f32.vlgmr.msrb.gmra.mxu2 %vm37_vm0, %v238_v12 }
  0x13   :  { %364 = vmatmul.msk.f32.vlgmr.msrb.gmra.mxu3 %vm37_vm0, %v265_v13 }
  0x14   :  { %361 = vmatmul.msk.f32.vlgmr.msrb.gmra.mxu0 %vm37_vm0, %v189_v14 }
  0x15   :  { %362 = vmatmul.msk.f32.vlgmr.msrb.gmra.mxu1 %vm37_vm0, %v186_v15 }
  0x89   :  { %v58_v16 = vpop.f32.mrf.mxu0 }
  0x8a   :  { %v81_v17 = vpop.f32.mrf.mxu1 }
  0x8b   :  { %v82_v18 = vadd.f32 %v81_v17, %v58_v16 }
  0x8d   :  { %v107_v19 = vpop.f32.mrf.mxu2 }
  0x8e   :  { %v134_v20 = vpop.f32.mrf.mxu3  ;;  %v110_v21 = vadd.f32 %v107_v19, %v82_v18 }
  0x90   :  { %v137_v22 = vadd.f32 %v134_v20, %v110_v21 }
  0x91   :  { %v212_v24 = vpop.f32.mrf.mxu0 }
  0x92   :  { %v138_v23 = vmul.f32 %v137_v22, %v137_v22  ;;  %v235_v25 = vpop.f32.mrf.mxu1 }
  0x93   :  { %v236_v26 = vadd.f32 %v235_v25, %v212_v24 }
  0x94   :  { %139 = vadd.xlane.f32.xlu0 %v138_v23 }
  0x95   :  { %v261_v27 = vpop.f32.mrf.mxu2 }
  0x96   :  { %v288_v28 = vpop.f32.mrf.mxu3  ;;  %v264_v29 = vadd.f32 %v261_v27, %v236_v26 }
  0x98   :  { %v291_v30 = vadd.f32 %v288_v28, %v264_v29  ;;  %v336_v29 = vld [vmem:[%s524_s1 + $0x1] sm:$0x1] }
  0x9a   :  { %v292_v31 = vmul.f32 %v291_v30, %v291_v30 }
  0x9c   :  { %293 = vadd.xlane.f32.xlu0 %v292_v31 }
 0x107   :  { %v140_v32 = vpop.xlane.xlu0 %139 }
 0x108   :  { %v141_v33 = vrot.slane %v140_v32, 4 }
 0x10a   :  { %v142_v34 = vadd.f32 %v141_v33, %v140_v32 }
 0x10c   :  { %v143_v35 = vrot.slane %v142_v34, 2 }
 0x10e   :  { %v144_v36 = vadd.f32 %v143_v35, %v142_v34 }
 0x10f   :  { %v294_v50 = vpop.xlane.xlu0 %293 }
 0x110   :  { %v145_v37 = vrot.slane %v144_v36, 1  ;;  %v295_v52 = vrot.slane %v294_v50, 4 }
 0x112   :  { %v146_v38 = vadd.f32 %v145_v37, %v144_v36  ;;  %v296_v53 = vadd.f32 %v295_v52, %v294_v50 }
 0x114   :  { %366 = vpush %v146_v38  ;;  %v297_v56 = vrot.slane %v296_v53, 2 }
 0x116   :  { %v298_v59 = vadd.f32 %v297_v56, %v296_v53 }
 0x118   :  { %v299_v62 = vrot.slane %v298_v59, 1 }
 0x11a   :  { %v300_v3 = vadd.f32 %v299_v62, %v298_v59 }
 0x145   :  { %s367_s0 = spop %366 }
 0x146   :  { %s148_s23 = smul.f32 0.003787879, %s367_s0 }
 0x148   :  { %s150_s24 = sadd.f32 1e-08, %s148_s23 }
 0x14a   :  { %v151_v39 = vstv %s150_s24 }
 0x14b   :  { %380 = vrcp.f32 %v151_v39  ;;  %v163_v43 = vand.u32 2147483648, %v151_v39  ;;  %v161_v45 = vand.u32 2147483647, %v151_v39  ;;  %vm157_vm2 = vweird.f32 %v151_v39 }
 0x14d   :  { %v164_v47 = vor.u32 1.1754944e-38, %v163_v43  ;;  %vm162_vm4 = vcmp.eq.f32.partialorder %v161_v45, 8.507059e+37 }
 0x151   :  { %v381_v40 = vpop.eup %380 }
 0x152   :  { %v153_v41 = vmul.f32 %v381_v40, %v151_v39  ;;  %vm158_vm1 = vweird.f32 %v381_v40 }
 0x153   :  { %vm159_vm3 = vmor %vm157_vm2, %vm158_vm1 }
 0x154   :  { %v154_v42 = vsub.f32 1.0, %v153_v41 }
 0x156   :  { %v155_v44 = vmul.f32 %v381_v40, %v154_v42 }
 0x158   :  { %v156_v46 = vadd.f32 %v381_v40, %v155_v44 }
 0x15a   :  { %v160_v48 = vsel %vm159_vm3, %v381_v40, %v156_v46 }
 0x15b   :  { %v165_v49 = vsel %vm162_vm4, %v164_v47, %v160_v48 }
 0x15c   :  { %368 = vpush %v165_v49 }
 0x18d   :  { %s369_s25 = spop %368 }
 0x18e   :  { %s167_s26 = smul.f32 %s369_s25, %s149_s3 }
 0x190   :  { %v168_v51 = vstv %s167_s26 }
 0x191   :  { %382 = vrsqrt.f32 %v168_v51  ;;  %vm176_vm5 = vcmp.eq.f32.partialorder %v168_v51, inf  ;;  %v179_v0 = vand.u32 2147483648, %v168_v51  ;;  %vm178_vm6 = vcmp.eq.f32.partialorder %v168_v51, 0.0 }
 0x197   :  { %v383_v54 = vpop.eup %382 }
 0x198   :  { %v170_v55 = vmul.f32 %v383_v54, %v168_v51 }
 0x19a   :  { %v171_v57 = vmul.f32 %v383_v54, %v170_v55 }
 0x19c   :  { %v172_v58 = vmul.f32 0.5, %v171_v57 }
 0x19e   :  { %v173_v60 = vsub.f32 1.5, %v172_v58 }
 0x1a0   :  { %v174_v61 = vmul.f32 %v383_v54, %v173_v60 }
 0x1a2   :  { %v175_v63 = vmul.f32 %v174_v61, %v168_v51 }
 0x1a4   :  { %v177_v1 = vsel %vm176_vm5, %v168_v51, %v175_v63 }
 0x1a5   :  { %v180_v2 = vsel %vm178_vm6, %v179_v0, %v177_v1 }
 0x1a6   :  { %370 = vpush %v180_v2 }
 0x1a7   :  { %372 = vpush %v300_v3 }
 0x1d7   :  { %s371_s29 = spop %370 }
 0x1d8   :  { %v183_v5 = vstv %s371_s29  ;;  %s373_s30 = spop %372 }
 0x1d9   :  { %v184_v6 = vmul.f32 %v183_v5, %v182_v4  ;;  %s302_s5 = smul.f32 0.003787879, %s373_s30 }
 0x1db   :  { %185 = vst [vmem:[#allocation5] sm:$0x1] %v184_v6  ;;  %s304_s6 = sadd.f32 1e-08, %s302_s5 }
 0x1dd   :  { %v305_v7 = vstv %s304_s6 }
 0x1de   :  { %384 = vrcp.f32 %v305_v7  ;;  %v317_v11 = vand.u32 2147483648, %v305_v7  ;;  %v315_v13 = vand.u32 2147483647, %v305_v7  ;;  %vm311_vm8 = vweird.f32 %v305_v7 }
 0x1e0   :  { %v318_v15 = vor.u32 1.1754944e-38, %v317_v11  ;;  %vm316_vm10 = vcmp.eq.f32.partialorder %v315_v13, 8.507059e+37 }
 0x1e4   :  { %v385_v8 = vpop.eup %384 }
 0x1e5   :  { %v307_v9 = vmul.f32 %v385_v8, %v305_v7  ;;  %vm312_vm7 = vweird.f32 %v385_v8 }
 0x1e6   :  { %vm313_vm9 = vmor %vm311_vm8, %vm312_vm7 }
 0x1e7   :  { %v308_v10 = vsub.f32 1.0, %v307_v9 }
 0x1e9   :  { %v309_v12 = vmul.f32 %v385_v8, %v308_v10 }
 0x1eb   :  { %v310_v14 = vadd.f32 %v385_v8, %v309_v12 }
 0x1ed   :  { %v314_v16 = vsel %vm313_vm9, %v385_v8, %v310_v14 }
 0x1ee   :  { %v319_v17 = vsel %vm316_vm10, %v318_v15, %v314_v16 }
 0x1ef   :  { %374 = vpush %v319_v17 }
 0x220   :  { %s375_s8 = spop %374 }
 0x221   :  { %s321_s9 = smul.f32 %s375_s8, %s365_s7 }
 0x223   :  { %v322_v18 = vstv %s321_s9 }
 0x224   :  { %386 = vrsqrt.f32 %v322_v18  ;;  %vm330_vm11 = vcmp.eq.f32.partialorder %v322_v18, inf  ;;  %v333_v26 = vand.u32 2147483648, %v322_v18  ;;  %vm332_vm12 = vcmp.eq.f32.partialorder %v322_v18, 0.0 }
 0x22a   :  { %v387_v19 = vpop.eup %386 }
 0x22b   :  { %v324_v20 = vmul.f32 %v387_v19, %v322_v18 }
 0x22d   :  { %v325_v21 = vmul.f32 %v387_v19, %v324_v20 }
 0x22f   :  { %v326_v22 = vmul.f32 0.5, %v325_v21 }
 0x231   :  { %v327_v23 = vsub.f32 1.5, %v326_v22 }
 0x233   :  { %v328_v24 = vmul.f32 %v387_v19, %v327_v23 }
 0x235   :  { %v329_v25 = vmul.f32 %v328_v24, %v322_v18 }
 0x237   :  { %v331_v27 = vsel %vm330_vm11, %v322_v18, %v329_v25 }
 0x238   :  { %v334_v28 = vsel %vm332_vm12, %v333_v26, %v331_v27 }
 0x239   :  { %376 = vpush %v334_v28 }
 0x26a   :  { %s377_s16 = spop %376 }
 0x26b   :  { %v337_v30 = vstv %s377_s16 }
 0x26c   :  { %v338_v31 = vmul.f32 %v337_v30, %v336_v29 }
 0x26e   :  { %339 = vst [vmem:[#allocation5 + $0x1] sm:$0x1] %v338_v31 }
 0x26f   :  { %350 = dma.vmem_to_hbm [thread:$0]  %s346_s13, 32, %s348_s2, [#allocation3]  }
 0x270   :  { %426 = dma.done.wait [#allocation3], 32  }
 0x271   :  { %427 = vsyncadd [#allocation3], 4294967264 }
 0x272   :  { %355 = vsyncpa [#allocation3], 1 }
 0x273   :  { %356 = vsyncpa [#allocation4], 1 }

</bundles_post_ra>
